<compile_context>
chip_gen: v5e
topology: v5e:2x2
jax: 0.10.0
libtpu: 0.0.40
codegen_flags: <defaults>
</compile_context>

<pallas_src>
import jax
import jax.numpy as jnp
from jax.experimental import pallas as pl
from jax.experimental.pallas import tpu as pltpu


def _round_up(x: int, m: int) -> int:
    return (x + m - 1) // m * m


# ----------------------------- fused Pallas kernel --------------------------
def gcn_fused_kernel(x_ref, adj_ref, w1_ref, b1_ref, w2_ref, b2_ref, o_ref):
    """Fused 2-layer GCN on one row-tile of x.

    x_ref   : (tm, Np)  compute dtype (bf16)  -- streamed per grid step
    adj_ref : (Np, Np)  compute dtype         -- VMEM-resident (constant block)
    w1_ref  : (Np, Hp)  compute dtype         -- VMEM-resident
    b1_ref  : (1,  Hp)  f32                   -- VMEM-resident
    w2_ref  : (Hp, Op)  compute dtype         -- VMEM-resident
    b2_ref  : (1,  Op)  f32                   -- VMEM-resident
    o_ref   : (tm, Op)  f32
    """
    f32 = jnp.float32
    cd = x_ref.dtype
    x = x_ref[...]
    adj = adj_ref[...]

    # ---- layer 1: h = relu((x @ adj) @ W1 + b1) ----------------------------
    s1 = jnp.dot(x, adj, preferred_element_type=f32)            # MXU, f32 acc
    h = jnp.dot(s1.astype(cd), w1_ref[...], preferred_element_type=f32)
    h = jnp.maximum(h + b1_ref[...], 0.0)                       # f32 epilogue

    # F.dropout(p=0.5, training=False) -> identity in eval mode.

    # ---- layer 2: out = (h @ adj) @ W2 + b2  (no activation) ---------------
    s2 = jnp.dot(h.astype(cd), adj, preferred_element_type=f32)
    out = jnp.dot(s2.astype(cd), w2_ref[...], preferred_element_type=f32)
    o_ref[...] = (out + b2_ref[...]).astype(o_ref.dtype)


# ----------------------------- wrapper ---------------------------------------
def gcn_forward(x, adj, params, *, compute_dtype=jnp.bfloat16, tm=256):
    """Fused GCN forward. x:(M,N), adj:(N,N), W1:(N,H), W2:(H,O). Requires H==N."""
    M, N = x.shape
    H = params["w1"].shape[1]
    O = params["w2"].shape[1]
    if adj.shape != (N, N):
        raise ValueError("adj must be (input_size, input_size)")
    if H != N:
        raise ValueError("torch.mm chaining (h @ adj) requires hidden == input_size")

    # Pad feature dims to lane width (128); pad rows to a 16-multiple row tile.
    Np = _round_up(N, 128)
    Hp = _round_up(H, 128)          # == Np since H == N
    Op = _round_up(O, 128)
    tm = _round_up(min(tm, M), 16)
    Mp = _round_up(M, tm)

    cd = compute_dtype
    f32 = jnp.float32
    xp = jnp.zeros((Mp, Np), cd).at[:M, :N].set(x.astype(cd))
    adjp = jnp.zeros((Np, Np), cd).at[:N, :N].set(adj.astype(cd))
    w1p = jnp.zeros((Np, Hp), cd).at[:N, :H].set(params["w1"].astype(cd))
    w2p = jnp.zeros((Hp, Op), cd).at[:H, :O].set(params["w2"].astype(cd))
    b1p = jnp.zeros((1, Hp), f32).at[0, :H].set(params["b1"].astype(f32))
    b2p = jnp.zeros((1, Op), f32).at[0, :O].set(params["b2"].astype(f32))

    grid = (Mp // tm,)

    in_specs = [
        pl.BlockSpec((tm, Np), lambda i: (i, 0)),   # x rows: streamed / pipelined
        pl.BlockSpec((Np, Np), lambda i: (0, 0)),   # adj: fetched once, resident
        pl.BlockSpec((Np, Hp), lambda i: (0, 0)),   # W1: resident
        pl.BlockSpec((1, Hp), lambda i: (0, 0)),    # b1: resident
        pl.BlockSpec((Hp, Op), lambda i: (0, 0)),   # W2: resident
        pl.BlockSpec((1, Op), lambda i: (0, 0)),    # b2: resident
    ]
    out_specs = pl.BlockSpec((tm, Op), lambda i: (i, 0))

    itm = jnp.dtype(cd).itemsize
    flops = 2 * Mp * (Np * Np + Np * Hp + Hp * Np + Hp * Op)
    bytes_accessed = (
        (Mp * Np + Np * Np + Np * Hp + Hp * Op) * itm
        + (Hp + Op) * 4
        + Mp * Op * 4
    )

    out = pl.pallas_call(
        gcn_fused_kernel,
        grid=grid,
        in_specs=in_specs,
        out_specs=out_specs,
        out_shape=jax.ShapeDtypeStruct((Mp, Op), f32),
        compiler_params=pltpu.CompilerParams(
            # Row axis is embarrassingly parallel -> shard over v7x's 2 TCs.
            dimension_semantics=("parallel",),
            # Above the 32 MiB default scoped limit, below v7x's 64 MiB physical.
            vmem_limit_bytes=48 * 1024 * 1024,
        ),
        cost_estimate=pl.CostEstimate(
            flops=flops, transcendentals=0, bytes_accessed=bytes_accessed
        ),
    )(xp, adjp, w1p, b1p, w2p, b2p)

    return out[:M, :O]


# --------------------------- deterministic init ------------------------------
def init_params(key, input_size, hidden, output_size):
    k1, k2 = jax.random.split(key)
    # hidden layer: kaiming_uniform_(nonlinearity='relu') -> bound = sqrt(6/fan_in)
    bound1 = (6.0 / input_size) ** 0.5
    w1 = jax.random.uniform(
        k1, (input_size, hidden), jnp.float32, minval=-bound1, maxval=bound1
    )
    b1 = jnp.zeros((hidden,), jnp.float32)
    # out layer: xavier_uniform_ -> bound = sqrt(6/(fan_in+fan_out))
    bound2 = (6.0 / (hidden + output_size)) ** 0.5
    w2 = jax.random.uniform(
        k2, (hidden, output_size), jnp.float32, minval=-bound2, maxval=bound2
    )
    b2 = jnp.zeros((output_size,), jnp.float32)
    return {"w1": w1, "b1": b1, "w2": w2, "b2": b2}


# --------------------------- pure-JAX references ------------------------------
def ref_forward_matched(x, adj, params, compute_dtype):
    """Same bf16-in / f32-accumulate path as the kernel (bitwise-comparable)."""
    cd = compute_dtype
    f32 = jnp.float32
    s1 = jnp.dot(x.astype(cd), adj.astype(cd), preferred_element_type=f32)
    h = jnp.dot(s1.astype(cd), params["w1"].astype(cd), preferred_element_type=f32)
    h = jnp.maximum(h + params["b1"].astype(f32), 0.0)
    s2 = jnp.dot(h.astype(cd), adj.astype(cd), preferred_element_type=f32)
    out = jnp.dot(s2.astype(cd), params["w2"].astype(cd), preferred_element_type=f32)
    return out + params["b2"].astype(f32)


if __name__ == "__main__":
    # Small shapes consistent with the module: input_size == hidden == 16
    # (required by the x @ adj chaining), output_size = 8, M = 48 nodes.
    # tm=16 => 3 grid steps: exercises row streaming + resident adj/W blocks.
    M, N, H, O = 48, 16, 16, 8

    key = jax.random.PRNGKey(0)
    kx, kadj, kp = jax.random.split(key, 3)

    x = jax.random.normal(kx, (M, N), jnp.float32)
    adj = jax.random.uniform(kadj, (N, N), jnp.float32)
    params = init_params(kp, input_size=N, hidden=H, output_size=O)

    out = gcn_forward(x, adj, params, tm=16)
    jax.block_until_ready(out)

    assert out.shape == (M, O)

    # Check against a reference using the identical bf16-in / f32-acc math.
    ref = ref_forward_matched(x, adj, params, jnp.bfloat16)
    assert jnp.allclose(out, ref, atol=2e-3, rtol=2e-3), float(
        jnp.max(jnp.abs(out - ref))
    )

    # Loose guard against the pure-f32 PyTorch-equivalent math (bf16 inputs add
    # small rounding; this only catches gross errors).
    ref_f32 = jnp.maximum(x @ adj @ params["w1"] + params["b1"], 0.0)
    ref_f32 = ref_f32 @ adj @ params["w2"] + params["b2"]
    assert jnp.allclose(out, ref_f32, atol=0.5, rtol=0.25)

    print("KERNEL_OK")
</pallas_src>

<mosaic_0001>
module attributes {stable_mosaic.version = 11 : i64} {
  func.func @gcn_fused_kernel(%arg0: i32, %arg1: memref<16x128xbf16, #tpu.memory_space<vmem>>, %arg2: memref<128x128xbf16, #tpu.memory_space<vmem>>, %arg3: memref<128x128xbf16, #tpu.memory_space<vmem>>, %arg4: memref<1x128xf32, #tpu.memory_space<vmem>>, %arg5: memref<128x128xbf16, #tpu.memory_space<vmem>>, %arg6: memref<1x128xf32, #tpu.memory_space<vmem>>, %arg7: memref<16x128xf32, #tpu.memory_space<vmem>>) attributes {dimension_semantics = [#tpu.dimension_semantics<parallel>], iteration_bounds = array<i64: 3>, scalar_prefetch = 0 : i64, scratch_operands = 0 : i64, tpu.core_type = #tpu.core_type<tc>, window_params = [{transform_indices = @transform_0, window_bounds = array<i64: 16, 128>}, {pipeline_mode = #tpu.pipeline_mode<synchronous>, transform_indices = @transform_1, window_bounds = array<i64: 128, 128>}, {pipeline_mode = #tpu.pipeline_mode<synchronous>, transform_indices = @transform_2, window_bounds = array<i64: 128, 128>}, {pipeline_mode = #tpu.pipeline_mode<synchronous>, transform_indices = @transform_3, window_bounds = array<i64: 1, 128>}, {pipeline_mode = #tpu.pipeline_mode<synchronous>, transform_indices = @transform_4, window_bounds = array<i64: 128, 128>}, {pipeline_mode = #tpu.pipeline_mode<synchronous>, transform_indices = @transform_5, window_bounds = array<i64: 1, 128>}, {transform_indices = @transform_6, window_bounds = array<i64: 16, 128>}]} {
    %c0 = arith.constant 0 : index
    %c0_0 = arith.constant 0 : index
    %0 = vector.load %arg1[%c0, %c0_0] : memref<16x128xbf16, #tpu.memory_space<vmem>>, vector<16x128xbf16>
    %c0_1 = arith.constant 0 : index
    %c0_2 = arith.constant 0 : index
    %1 = vector.load %arg2[%c0_1, %c0_2] : memref<128x128xbf16, #tpu.memory_space<vmem>>, vector<128x128xbf16>
    %cst = arith.constant dense<0.000000e+00> : vector<16x128xf32>
    %2 = tpu.matmul %0, %1, %cst {dimension_numbers = #tpu.dot_dimension_numbers<[1], [0], [0], [1], [0, 0, 1, 1], [], []>} : vector<16x128xbf16>, vector<128x128xbf16>, vector<16x128xf32> -> vector<16x128xf32>
    %3 = arith.truncf %2 : vector<16x128xf32> to vector<16x128xbf16>
    %c0_3 = arith.constant 0 : index
    %c0_4 = arith.constant 0 : index
    %4 = vector.load %arg3[%c0_3, %c0_4] : memref<128x128xbf16, #tpu.memory_space<vmem>>, vector<128x128xbf16>
    %cst_5 = arith.constant dense<0.000000e+00> : vector<16x128xf32>
    %5 = tpu.matmul %3, %4, %cst_5 {dimension_numbers = #tpu.dot_dimension_numbers<[1], [0], [0], [1], [0, 0, 1, 1], [], []>} : vector<16x128xbf16>, vector<128x128xbf16>, vector<16x128xf32> -> vector<16x128xf32>
    %c0_6 = arith.constant 0 : index
    %c0_7 = arith.constant 0 : index
    %6 = vector.load %arg4[%c0_6, %c0_7] : memref<1x128xf32, #tpu.memory_space<vmem>>, vector<1x128xf32>
    %7 = vector.broadcast %6 : vector<1x128xf32> to vector<16x128xf32>
    %8 = arith.addf %5, %7 : vector<16x128xf32>
    %cst_8 = arith.constant 0.000000e+00 : f32
    %9 = vector.broadcast %cst_8 : f32 to vector<16x128xf32>
    %10 = arith.maximumf %8, %9 : vector<16x128xf32>
    %11 = arith.truncf %10 : vector<16x128xf32> to vector<16x128xbf16>
    %cst_9 = arith.constant dense<0.000000e+00> : vector<16x128xf32>
    %12 = tpu.matmul %11, %1, %cst_9 {dimension_numbers = #tpu.dot_dimension_numbers<[1], [0], [0], [1], [0, 0, 1, 1], [], []>} : vector<16x128xbf16>, vector<128x128xbf16>, vector<16x128xf32> -> vector<16x128xf32>
    %13 = arith.truncf %12 : vector<16x128xf32> to vector<16x128xbf16>
    %c0_10 = arith.constant 0 : index
    %c0_11 = arith.constant 0 : index
    %14 = vector.load %arg5[%c0_10, %c0_11] : memref<128x128xbf16, #tpu.memory_space<vmem>>, vector<128x128xbf16>
    %cst_12 = arith.constant dense<0.000000e+00> : vector<16x128xf32>
    %15 = tpu.matmul %13, %14, %cst_12 {dimension_numbers = #tpu.dot_dimension_numbers<[1], [0], [0], [1], [0, 0, 1, 1], [], []>} : vector<16x128xbf16>, vector<128x128xbf16>, vector<16x128xf32> -> vector<16x128xf32>
    %c0_13 = arith.constant 0 : index
    %c0_14 = arith.constant 0 : index
    %16 = vector.load %arg6[%c0_13, %c0_14] : memref<1x128xf32, #tpu.memory_space<vmem>>, vector<1x128xf32>
    %17 = vector.broadcast %16 : vector<1x128xf32> to vector<16x128xf32>
    %18 = arith.addf %15, %17 : vector<16x128xf32>
    %c0_15 = arith.constant 0 : index
    %c0_16 = arith.constant 0 : index
    %19 = vector.load %arg7[%c0_15, %c0_16] : memref<16x128xf32, #tpu.memory_space<vmem>>, vector<16x128xf32>
    tpu.vector_store %arg7[%c0_15, %c0_16], %18 {strides = array<i32>} : memref<16x128xf32, #tpu.memory_space<vmem>>, vector<16x128xf32>,
    return
  }
  func.func @transform_0(%arg0: i32) -> (i32, i32) {
    %c0_i32 = arith.constant 0 : i32
    %c0_i32_0 = arith.constant 0 : i32
    return %arg0, %c0_i32 : i32, i32
  }
  func.func @transform_1(%arg0: i32) -> (i32, i32) {
    %c0_i32 = arith.constant 0 : i32
    %c0_i32_0 = arith.constant 0 : i32
    %c0_i32_1 = arith.constant 0 : i32
    return %c0_i32, %c0_i32_0 : i32, i32
  }
  func.func @transform_2(%arg0: i32) -> (i32, i32) {
    %c0_i32 = arith.constant 0 : i32
    %c0_i32_0 = arith.constant 0 : i32
    %c0_i32_1 = arith.constant 0 : i32
    return %c0_i32, %c0_i32_0 : i32, i32
  }
  func.func @transform_3(%arg0: i32) -> (i32, i32) {
    %c0_i32 = arith.constant 0 : i32
    %c0_i32_0 = arith.constant 0 : i32
    %c0_i32_1 = arith.constant 0 : i32
    return %c0_i32, %c0_i32_0 : i32, i32
  }
  func.func @transform_4(%arg0: i32) -> (i32, i32) {
    %c0_i32 = arith.constant 0 : i32
    %c0_i32_0 = arith.constant 0 : i32
    %c0_i32_1 = arith.constant 0 : i32
    return %c0_i32, %c0_i32_0 : i32, i32
  }
  func.func @transform_5(%arg0: i32) -> (i32, i32) {
    %c0_i32 = arith.constant 0 : i32
    %c0_i32_0 = arith.constant 0 : i32
    %c0_i32_1 = arith.constant 0 : i32
    return %c0_i32, %c0_i32_0 : i32, i32
  }
  func.func @transform_6(%arg0: i32) -> (i32, i32) {
    %c0_i32 = arith.constant 0 : i32
    %c0_i32_0 = arith.constant 0 : i32
    return %arg0, %c0_i32 : i32, i32
  }
}

</mosaic_0001>

<bundles_post_ra>
// kernel: tpu_custom_call.1
= control target key start
LH: loop header
LB: loop body
LE: loop exit
PB: predicated region body
PF: predicated region fallthrough
CT: control target
= control target key end

     0   :  { %11 = vsyncpa [#allocation3], 0  ;;  %s1359_s0 = inlined_call_operand.hbm [shape: bf16[48,128], index: 0, kind: input, shape index: {}]   ;;  %s1360_s1 = inlined_call_operand.hbm [shape: bf16[128,128], index: 1, kind: input, shape index: {}]   ;;  %s1361_s2 = inlined_call_operand.hbm [shape: bf16[128,128], index: 2, kind: input, shape index: {}]   ;;  %s1362_s3 = inlined_call_operand.vmem [shape: f32[1,128], index: 3, kind: input, shape index: {}]   ;;  %s1363_s4 = inlined_call_operand.hbm [shape: bf16[128,128], index: 4, kind: input, shape index: {}]   ;;  %s1364_s5 = inlined_call_operand.vmem [shape: f32[1,128], index: 5, kind: input, shape index: {}]   ;;  %s1365_s6 = inlined_call_operand.hbm [shape: f32[48,128], index: 6, kind: output, shape index: {}]  }
   0x1   :  { %13 = vsyncpa [#allocation3 + $0x1], 0 }
   0x2   :  { %14 = vsyncpa [#allocation6], 0 }
   0x3   :  { %15 = vsyncpa [#allocation9], 0 }
   0x4   :  { %16 = vsyncpa [#allocation4], 0 }
   0x5   :  { %18 = vsyncpa [#allocation4 + $0x1], 0  ;;  %s1181_s21 = smov 0   ;;  %s1183_s22 = smov 0  }
   0x6   :  { %s1185_s23 = smov 0   ;;  %s1187_s24 = smov 0  }
   0x7 LB: > { %s1202_s25 = sadd.s32 4294967295, %s1137_s24   ;;  %s713_s26 = sadd.s32 4294967294, %s1137_s24   ;;  %s1137_s24 = sphi %s1187_s24, %s1379_s24   ;;  %s1133_s23 = sphi %s1185_s23, %s1378_s23   ;;  %s1129_s22 = sphi %s1183_s22, %s1377_s22   ;;  %s1125_s21 = sphi %s1181_s21, %s1376_s21  }
   0x8   : > { %p44_p0 = scmp.ne.s32.totalorder %s1129_s22, %s1125_s21  ;;  %p45_p1 = scmp.eq.s32.totalorder %s1202_s25, 0 }
   0x9   : > { %p173_p2 = scmp.eq.s32.totalorder %s1202_s25, 2  ;;  %p179_p3 = scmp.eq.s32.totalorder %s713_s26, 2 }
   0xa   : > { %p1211_p4 = por %p45_p1, %p44_p0  ;;  %p714_p5 = scmp.ge.s32.totalorder %s1137_s24, 1 }
   0xb   : > { %p1216_p6 = por %p179_p3, %p44_p0  ;;  %p186_p7 = scmp.lt.s32.totalorder %s1137_s24, 4 }
   0xc   : > { %s197_s7 = sshll.u32 %s1360_s1, 4  ;;  %s1139_s9 = smov [#allocation5]   ;;  %s198_s7 = int_to_ptr.hbm [resolvable:$true] %s197_s7 }
   0xd   : > { %p1224_p8 = pnand %p714_p5, %p186_p7  ;;  %s199_s10 = sshll.u32 %s1139_s9, 4  ;;  %s200_s10 = int_to_ptr.vmem [resolvable:$true] %s199_s10 }
   0xe   : > { %s211_s14 = sshll.u32 %s1361_s2, 4  ;;  %s1366_s15 = smov 64   ;;  %s212_s14 = int_to_ptr.hbm [resolvable:$true] %s211_s14 }
   0xf   : > { %p876_p9 = pneg %p1224_p8  ;;  %s1367_s16 = smov 4  }
  0x10   : > { %s1142_s17 = smov [#allocation7]   ;;  %s228_s26 = sshll.u32 %s1363_s4, 4  ;;  %s229_s26 = int_to_ptr.hbm [resolvable:$true] %s228_s26 }
  0x11   : > { %p1232_p10 = pnand %p876_p9, %p45_p1  ;;  %s213_s18 = sshll.u32 %s1142_s17, 4  ;;  %s214_s18 = int_to_ptr.vmem [resolvable:$true] %s213_s18 }
  0x12   : > { %s1143_s29 = smov [#allocation8]   ;;  %p38_p12 = scmp.ne.s32.totalorder %s1133_s23, %s1129_s22 }
  0x13   : > { %879 = dma.hbm_to_vmem [thread:$0]  (!%p1232_p10), %s198_s7, 1024, %s200_s10, [#allocation6], %s1366_s15, %s1366_s15, %s1367_s16  }
  0x14   : > { %882 = dma.hbm_to_vmem [thread:$0]  (!%p1232_p10), %s212_s14, 1024, %s214_s18, [#allocation6], %s1366_s15, %s1366_s15, %s1367_s16  }
  0x15   : > { %s230_s30 = sshll.u32 %s1143_s29, 4  ;;  %s1253_s7 = sadd.s32 1, %s1137_s24   ;;  %s231_s30 = int_to_ptr.vmem [resolvable:$true] %s230_s30 }
  0x16   : > { %885 = dma.hbm_to_vmem [thread:$0]  (!%p1232_p10), %s229_s26, 1024, %s231_s30, [#allocation9], %s1366_s15, %s1366_s15, %s1367_s16  }
  0x17   : > { %s28_s9 = ssub.s32 %s1137_s24, %s1253_s7  ;;  %s31_s10 = sadd.s32 1, %s1133_s23 }
  0x18   : > { %p29_p11 = scmp.eq.s32.totalorder %s28_s9, 0  ;;  %p39_p13 = scmp.eq.s32.totalorder %s1137_s24, 0 }
  0x19   : > { %p1271_p0 = por %p173_p2, %p38_p12  ;;  %p897_p3 = scmp.lt.s32.totalorder %s1137_s24, 3 }
  0x1a   : > { %s1267_s12 = scalar_select %p29_p11, %s1133_s23, %s31_s10  }
  0x1b   : > { %s247_s14 = sand.u32 1, %s1133_s23   ;;  %s833_s11 = sshll.u32 %s1137_s24, 3 }
  0x1c   : > { %p40_p5 = por %p39_p13, %p38_p12  ;;  %s719_s17 = sshll.u32 %s247_s14, 3 }
  0x1d   : > { %s256_s20 = scalar_lea.hbm %s1359_s0, %s833_s11  ;;  %s251_s29 = scalar_lea.vmem [#allocation2], %s719_s17 }
  0x1e   : > { %s257_s26 = sshll.u32 %s256_s20, 4  ;;  %s259_s30 = sshll.u32 %s251_s29, 4  ;;  %s258_s26 = int_to_ptr.hbm [resolvable:$true] %s257_s26  ;;  %s260_s30 = int_to_ptr.vmem [resolvable:$true] %s259_s30 }
  0x1f   : > { %p1281_p7 = pnand %p897_p3, %p40_p5  ;;  %s248_s10 = scalar_lea.sflag [#allocation3], %s247_s14 }
  0x20   : > { %s1033_s15 = sshra.s32 %s258_s26, 4  ;;  %s1040_s17 = scalar_lea.hbm %s1359_s0, 24  ;;  %s1034_s15 = int_to_ptr.hbm [resolvable:$true] %s1033_s15 }
  0x21   : > { %s1035_s16 = scalar_lea.hbm %s1034_s15, 8  ;;  %p1037_p9 = pneg %p1281_p7 }
  0x22   : > { %p1036_p2 = scmp.ne.s32.totalorder %s1034_s15, %s1035_s16  ;;  %p1041_p12 = scmp.lt.s32.totalorder %s1034_s15, %s1359_s0 }
  0x23   : > { %p1042_p13 = scmp.lt.s32.totalorder %s1040_s17, %s1035_s16 }
  0x24   : > { %p1038_p10 = pnand %p1037_p9, %p1036_p2 }
  0x25   : > { %p1043_p3 = por %p1042_p13, %p1041_p12 }
  0x26   : > { %p1039_p11 = pneg %p1038_p10 }
  0x28   : > { %p1044_p5 = pnand %p1043_p3, %p1039_p11 }
  0x2a   : > { %1047 = shalt.err (!%p1044_p5)
}
  0x2b   : > { %s1374_s14 = smov 4   ;;  %s1375_s29 = smov 64  }
  0x2c   : > { %889 = dma.hbm_to_vmem [thread:$0]  (!%p1281_p7), %s258_s26, 128, %s260_s30, %s248_s10, %s1375_s29, %s1375_s29, %s1374_s14  }
  0x2d   : > { %271 = sbr.rel (%p1224_p8) target bundleno = 651 (0x28b), region = 44  ;;  %s1301_s11 = sand.u32 (!%p1224_p8), 1, %s1129_s22  }
  0x2e   : > { %s723_s15 = sshll.u32 (!%p1224_p8), %s1301_s11, 3  ;;  %s274_s16 = scalar_lea.sflag (!%p1224_p8), [#allocation3], %s1301_s11 }
  0x2f   : > { %s1305_s18 = scalar_lea.vmem (!%p1224_p8), [#allocation2], %s723_s15 }
  0x32   : > { %1108 = dma.done.wait (%p1211_p4), %s274_s16, 128  }
  0x33   : > { %1110 = vsyncadd (%p1211_p4), %s274_s16, 4294967168 }
  0x34   : > { %1112 = dma.done.wait (%p45_p1), [#allocation6], 2048  }
  0x35   : > { %1114 = vsyncadd (%p45_p1), [#allocation6], 4294965248 }
  0x36   : > { %1116 = dma.done.wait (%p45_p1), [#allocation9], 1024  }
  0x37   : > { %1118 = vsyncadd (%p45_p1), [#allocation9], 4294966272  ;;  %v842_v0 = vld [vmem:[#allocation5 + $0x38] sm:$0xff]  ;;  %v841_v1 = vld [vmem:[#allocation5 + $0x30] sm:$0xff]  ;;  %s727_s26 = sshll.u32 %s1301_s11, 4  ;;  %s859_s10 = sshll.u32 %s1202_s25, 4 }
  0x38   : > { %396 = vmatpush.bf16.msra.mxu0 %v842_v0  ;;  %496 = vmatpush.bf16.msra.mxu2 %v842_v0  ;;  %v850_v2 = vld [vmem:[#allocation7 + $0x38] sm:$0xff]  ;;  %v849_v3 = vld [vmem:[#allocation7 + $0x30] sm:$0xff]  ;;  %v840_v4 = vld [vmem:[#allocation5 + $0x28] sm:$0xff]  ;;  %s607_s20 = scalar_lea.hbm %s1365_s6, %s859_s10  ;;  %s321_s14 = scalar_lea.vmem [#allocation10], %s727_s26 }
  0x39   : > { %479 = vmatpush.bf16.msra.mxu1 %v850_v2  ;;  %v848_v5 = vld [vmem:[#allocation7 + $0x28] sm:$0xff]  ;;  %v839_v6 = vld [vmem:[#allocation5 + $0x20] sm:$0xff]  ;;  %v838_v8 = vld [vmem:[#allocation5 + $0x18] sm:$0xff]  ;;  %s608_s29 = sshll.u32 %s321_s14, 4  ;;  %s610_s15 = sshll.u32 %s607_s20, 4  ;;  %s609_s29 = int_to_ptr.vmem [resolvable:$true] %s608_s29  ;;  %s611_s15 = int_to_ptr.hbm [resolvable:$true] %s610_s15 }
  0x3a   : > { %v847_v7 = vld [vmem:[#allocation7 + $0x20] sm:$0xff]  ;;  %v846_v9 = vld [vmem:[#allocation7 + $0x18] sm:$0xff]  ;;  %v837_v10 = vld [vmem:[#allocation5 + $0x10] sm:$0xff]  ;;  %s596_s16 = scalar_lea.sflag [#allocation4], %s1301_s11  ;;  %s1083_s26 = scalar_lea.hbm %s1365_s6, 48 }
  0x3b   : > { %v836_v11 = vld [vmem:[#allocation5 + $0x8] sm:$0xff]  ;;  %v835_v12 = vld [vmem:[#allocation5] sm:$0xff]  ;;  %v834_v13 = vld [vmem:[%s1305_s18] sm:$0xff]  ;;  %s1077_s18 = sshra.s32 %s611_s15, 4  ;;  %s1078_s18 = int_to_ptr.hbm [resolvable:$true] %s1077_s18 }
  0x3c   : > { %397 = vmatpush.bf16.msra.mxu0 %v841_v1  ;;  %497 = vmatpush.bf16.msra.mxu2 %v841_v1  ;;  %v845_v14 = vld [vmem:[#allocation7 + $0x10] sm:$0xff]  ;;  %v844_v15 = vld [vmem:[#allocation7 + $0x8] sm:$0xff]  ;;  %v843_v16 = vld [vmem:[#allocation7] sm:$0xff]  ;;  %s1079_s25 = scalar_lea.hbm %s1078_s18, 16  ;;  %p1084_p7 = scmp.lt.s32.totalorder %s1078_s18, %s1365_s6 }
  0x3d   : > { %480 = vmatpush.bf16.msra.mxu1 %v849_v3  ;;  %v858_v20 = vld [vmem:[#allocation8 + $0x38] sm:$0xff]  ;;  %v857_v21 = vld [vmem:[#allocation8 + $0x30] sm:$0xff]  ;;  %v856_v22 = vld [vmem:[#allocation8 + $0x28] sm:$0xff]  ;;  %p1080_p1 = scmp.ne.s32.totalorder %s1078_s18, %s1079_s25  ;;  %p1085_p2 = scmp.lt.s32.totalorder %s1083_s26, %s1079_s25 }
  0x3e   : > { %579 = vmatpush.bf16.msra.mxu3 %v858_v20  ;;  %v855_v23 = vld [vmem:[#allocation8 + $0x20] sm:$0xff]  ;;  %v854_v24 = vld [vmem:[#allocation8 + $0x18] sm:$0xff]  ;;  %v941_v26 = vld [vmem:[%s1362_s3] ss:$0 sm:$0xff] }
  0x3f   : > { %v853_v33 = vld [vmem:[#allocation8 + $0x10] sm:$0xff]  ;;  %v852_v34 = vld [vmem:[#allocation8 + $0x8] sm:$0xff]  ;;  %v851_v35 = vld [vmem:[#allocation8] sm:$0xff]  ;;  %p1081_p4 = pnand %p1080_p1, %p1271_p0  ;;  %p1086_p9 = por %p1085_p2, %p1084_p7 }
  0x40   : > { %398 = vmatpush.bf16.msra.mxu0 %v840_v4  ;;  %498 = vmatpush.bf16.msra.mxu2 %v840_v4  ;;  %v942_v39 = vld [vmem:[%s1364_s5] ss:$0 sm:$0xff] }
  0x41   : > { %481 = vmatpush.bf16.msra.mxu1 %v848_v5  ;;  %p1082_p8 = pneg %p1081_p4 }
  0x42   : > { %580 = vmatpush.bf16.msra.mxu3 %v857_v21 }
  0x43   : > { %p1087_p10 = pnand %p1086_p9, %p1082_p8 }
  0x44   : > { %399 = vmatpush.bf16.msra.mxu0 %v839_v6  ;;  %499 = vmatpush.bf16.msra.mxu2 %v839_v6 }
  0x45   : > { %482 = vmatpush.bf16.msra.mxu1 %v847_v7 }
  0x46   : > { %581 = vmatpush.bf16.msra.mxu3 %v856_v22 }
  0x48   : > { %400 = vmatpush.bf16.msra.mxu0 %v838_v8  ;;  %500 = vmatpush.bf16.msra.mxu2 %v838_v8 }
  0x49   : > { %483 = vmatpush.bf16.msra.mxu1 %v846_v9 }
  0x4a   : > { %582 = vmatpush.bf16.msra.mxu3 %v855_v23 }
  0x4c   : > { %401 = vmatpush.bf16.msra.mxu0 %v837_v10  ;;  %501 = vmatpush.bf16.msra.mxu2 %v837_v10 }
  0x4d   : > { %484 = vmatpush.bf16.msra.mxu1 %v845_v14 }
  0x4e   : > { %583 = vmatpush.bf16.msra.mxu3 %v854_v24 }
  0x50   : > { %402 = vmatpush.bf16.msra.mxu0 %v836_v11  ;;  %502 = vmatpush.bf16.msra.mxu2 %v836_v11 }
  0x51   : > { %485 = vmatpush.bf16.msra.mxu1 %v844_v15 }
  0x52   : > { %584 = vmatpush.bf16.msra.mxu3 %v853_v33 }
  0x54   : > { %403 = vmatpush.bf16.msra.mxu0 %v835_v12  ;;  %503 = vmatpush.bf16.msra.mxu2 %v835_v12 }
  0x55   : > { %486 = vmatpush.bf16.msra.mxu1 %v843_v16 }
  0x56   : > { %585 = vmatpush.bf16.msra.mxu3 %v852_v34 }
  0x57   : > { %404 = vmatmul.bf16.vlgmr.msra.gmra.mxu0 %v834_v13 }
  0x5a   : > { %586 = vmatpush.bf16.msra.mxu3 %v851_v35 }
  0xd4   : > { %v405_v17 = vpop.f32.mrf.mxu0 }
  0xdc   : > { %v407_v18 = vpop.f32.mrf.mxu0 }
  0xdd   : > { %v410_v19 = vpack.c.bf16 %v407_v18, %v405_v17 }
  0xdf   : > { %487 = vmatmul.bf16.vlgmr.msra.gmra.mxu1 %v410_v19 }
 0x15c   : > { %v488_v25 = vpop.f32.mrf.mxu1 }
 0x15d   : > { %v489_v27 = vadd.f32 %v941_v26, %v488_v25 }
 0x15f   : > { %v493_v30 = vmax.f32 %v489_v27, 0.0 }
 0x164   : > { %v490_v28 = vpop.f32.mrf.mxu1 }
 0x165   : > { %v491_v29 = vadd.f32 %v941_v26, %v490_v28 }
 0x167   : > { %v494_v31 = vmax.f32 %v491_v29, 0.0 }
 0x169   : > { %v495_v32 = vpack.c.bf16 %v494_v31, %v493_v30 }
 0x16b   : > { %504 = vmatmul.bf16.vlgmr.msra.gmra.mxu2 %v495_v32 }
 0x1ee   : > { %v505_v36 = vpop.f32.mrf.mxu2 }
 0x1f6   : > { %v507_v37 = vpop.f32.mrf.mxu2 }
 0x1f7   : > { %v510_v38 = vpack.c.bf16 %v507_v37, %v505_v36 }
 0x1f9   : > { %587 = vmatmul.bf16.vlgmr.msra.gmra.mxu3 %v510_v38 }
 0x27c   : > { %v588_v40 = vpop.f32.mrf.mxu3 }
 0x27d   : > { %v589_v41 = vadd.f32 %v942_v39, %v588_v40 }
 0x27f   : > { %593 = vst [vmem:[%s321_s14] sm:$0xff] %v589_v41 }
 0x284   : > { %v590_v42 = vpop.f32.mrf.mxu3 }
 0x285   : > { %v591_v43 = vadd.f32 %v942_v39, %v590_v42 }
 0x287   : > { %594 = vst [vmem:[%s321_s14 + $0x8] sm:$0xff] %v591_v43 }
 0x288   : > { %1090 = shalt.err (!%p1087_p10)
}
 0x289   : > { %s1144_s11 = smov 128   ;;  %s1145_s10 = smov 8  }
 0x28a   : > { %874 = dma.vmem_to_hbm [thread:$0]  (%p1271_p0), %s609_s29, 256, %s611_s15, %s596_s16, %s1144_s11, %s1144_s11, %s1145_s10  }
 0x28b PF: > { %p901_p11 = scmp.ge.s32.totalorder %s1137_s24, 2  ;;  %s625_s17 = sand.u32 1, %s1125_s21  }
 0x28c   : > { %s626_s19 = scalar_lea.sflag [#allocation4], %s625_s17 }
 0x28d   : > { %p891_p12 = pnand %p901_p11, %p1216_p6 }
 0x28f   : > { %p892_p13 = pneg %p891_p12 }
 0x291   : > { %1120 = dma.done.wait (%p892_p13), %s626_s19, 256  }
 0x292   : > { %1122 = vsyncadd (%p892_p13), %s626_s19, 4294967040  ;;  %p21_p3 = scmp.ge.s32.totalorder %s1253_s7, 5   ;;  %s1376_s21 = smov %s1129_s22 }
 0x293   : > { %s1377_s22 = smov %s1133_s23  ;;  %s1378_s23 = smov %s1267_s12 }
 0x294   : > { %s1379_s24 = smov %s1253_s7  ;;  %23 = sbr.rel (!%p21_p3) target bundleno = 7 (0x7), region = 101 }
 0x299   :  { %632 = vsyncpa [#allocation3], 1 }
 0x29a   :  { %634 = vsyncpa [#allocation3 + $0x1], 1 }
 0x29b   :  { %635 = vsyncpa [#allocation6], 1 }
 0x29c   :  { %636 = vsyncpa [#allocation9], 1 }
 0x29d   :  { %637 = vsyncpa [#allocation4], 1 }
 0x29e   :  { %639 = vsyncpa [#allocation4 + $0x1], 1 }

</bundles_post_ra>
